<compile_context>
chip_gen: v5e
topology: v5e:2x2
jax: 0.10.0
libtpu: 0.0.40
codegen_flags: <defaults>
</compile_context>

<pallas_src>
import math

import jax
import jax.numpy as jnp
from jax.experimental import pallas as pl
from jax.experimental.pallas import tpu as pltpu


def _round_up(n, m):
    return ((n + m - 1) // m) * m


def _tc_kernel(x_ref, m_ref, b3_ref, w1t_ref, b1_ref, w2_ref, b2_ref, out_ref):
    # Stage 1: all per-pair layers (ffns_00 fused with ffns_01·ffns_02) as one
    # matmul on the raw flattened input, + ReLU (ffns_02's activation).
    h3 = jnp.dot(x_ref[...], m_ref[...],
                 preferred_element_type=jnp.float32) + b3_ref[...]
    h3 = jnp.maximum(h3, 0.0)

    # Stage 2: ffns_1[0]: Linear(P*13 -> 100) + ReLU.
    z1 = jnp.dot(h3, w1t_ref[...],
                 preferred_element_type=jnp.float32) + b1_ref[...]
    z1 = jnp.maximum(z1, 0.0)

    # Stage 3: ffns_1[1]: Linear(100 -> 1) as VPU multiply + lane reduction
    # (avoids an N=1 MXU matmul), then sigmoid.
    z2 = jnp.sum(z1 * w2_ref[...], axis=-1, keepdims=True) + b2_ref[...]
    out_ref[...] = jax.nn.sigmoid(z2)


def _fold_params(params, P):
    """One-time weight plumbing: fold the whole per-pair stage into M, b3."""
    w00, b00 = params["w00"], params["b00"]          # (P, 2), (P,)
    W01, b01 = params["W01"], params["b01"]          # (20, 13), (20,)
    W02, b02 = params["W02"], params["b02"]          # (13, 20), (13,)

    # ffns_01 . ffns_02 fold (no nonlinearity between them).
    Wc = W01.T @ W02.T                               # (13, 13)
    bc = b01 @ W02.T + b02                           # (13,)

    # Fold ffns_00 and the per-pair block structure into one matrix acting on
    # the contiguous flattening x_flat[b, t*2P + 2j + c] = x[b, t, 2j + c]:
    #   M[(t, j, c), (k, u)] = delta(j, k) * w00[j, c] * Wc[t, u]
    eyeP = jnp.eye(P, dtype=jnp.float32)
    M = jnp.einsum("jc,tu,jk->tjcku", w00, Wc, eyeP).reshape(13 * 2 * P, P * 13)
    b3 = (b00[:, None] * Wc.sum(axis=0)[None, :] + bc[None, :]).reshape(1, P * 13)
    return M, b3


def time_combination_nn2_forward(x, params, *, tile_b=512):
    """x: (B, 13, 2*P) float32  ->  (B,) float32 (sigmoid probabilities)."""
    B, T, C2 = x.shape
    assert T == 13 and C2 % 2 == 0
    P = C2 // 2

    M, b3 = _fold_params(params, P)                  # (26P, 13P), (1, 13P)
    W1T = params["W1"].T                             # (13P, 100)
    b1_row = params["b1"].reshape(1, -1)             # (1, 100)
    w2_row = params["W2"].reshape(1, -1)             # (1, 100)
    b2_2d = params["b2"].reshape(1, 1)               # (1, 1)

    # Free reshape (contiguous last two dims) — no extra HBM pass.
    x_flat = x.reshape(B, T * C2)                    # (B, 26P)

    # Batch tiling (multiple of 8 sublanes); pad ragged batch.
    tile_b = min(tile_b, _round_up(B, 8))
    B_pad = _round_up(B, tile_b)
    if B_pad != B:
        x_flat = jnp.pad(x_flat, ((0, B_pad - B), (0, 0)))
    grid = (B_pad // tile_b,)

    const = lambda i: (0, 0)                         # weights stay VMEM-resident
    in_specs = [
        pl.BlockSpec((tile_b, T * C2), lambda i: (i, 0)),   # x tile (pipelined)
        pl.BlockSpec(M.shape, const),
        pl.BlockSpec(b3.shape, const),
        pl.BlockSpec(W1T.shape, const),
        pl.BlockSpec(b1_row.shape, const),
        pl.BlockSpec(w2_row.shape, const),
        pl.BlockSpec(b2_2d.shape, const),
    ]
    out_spec = pl.BlockSpec((tile_b, 1), lambda i: (i, 0))

    flops = 2 * B_pad * (2 * P * 13 * P * 13 + P * 13 * 100 + 100)
    bytes_accessed = 4 * (B_pad * (T * C2 + 1)
                          + M.size + b3.size + W1T.size + 200 + 1)
    cost = pl.CostEstimate(flops=int(flops), transcendentals=int(B_pad),
                           bytes_accessed=int(bytes_accessed))

    out = pl.pallas_call(
        _tc_kernel,
        out_shape=jax.ShapeDtypeStruct((B_pad, 1), jnp.float32),
        grid=grid,
        in_specs=in_specs,
        out_specs=out_spec,
        compiler_params=pltpu.CompilerParams(
            dimension_semantics=("parallel",),
            vmem_limit_bytes=32 * 1024 * 1024,
        ),
        cost_estimate=cost,
    )(x_flat, M, b3, W1T, b1_row, w2_row, b2_2d)
    return out[:B].reshape(B)


def init_params(key, P):
    """Deterministic init mirroring FFN.init_layer: kaiming-uniform W, zero b."""
    def kaiming_uniform(k, shape, fan_in):
        bound = math.sqrt(6.0 / fan_in)   # gain(relu)=sqrt(2), bound=gain*sqrt(3/fan_in)
        return jax.random.uniform(k, shape, jnp.float32, -bound, bound)

    ks = jax.random.split(key, 5)
    return {
        "w00": kaiming_uniform(ks[0], (P, 2), 2),        # ffns_00[j].lr1.weight rows
        "b00": jnp.zeros((P,), jnp.float32),
        "W01": kaiming_uniform(ks[1], (20, 13), 13),
        "b01": jnp.zeros((20,), jnp.float32),
        "W02": kaiming_uniform(ks[2], (13, 20), 20),
        "b02": jnp.zeros((13,), jnp.float32),
        "W1": kaiming_uniform(ks[3], (100, P * 13), P * 13),
        "b1": jnp.zeros((100,), jnp.float32),
        "W2": kaiming_uniform(ks[4], (1, 100), 100),
        "b2": jnp.zeros((1,), jnp.float32),
    }


def reference_forward(x, p):
    """Pure-JAX mirror of the PyTorch forward (eval mode)."""
    B, T, C2 = x.shape
    P = C2 // 2
    xp = jnp.transpose(x, (0, 2, 1))                 # (B, 2P, 13)
    pairs = xp.reshape(B, P, 2, 13)                  # pairs[b,j,c,t] = x[b,t,2j+c]
    h1 = jnp.einsum("bjct,jc->bjt", pairs, p["w00"]) + p["b00"][None, :, None]
    h2 = h1 @ p["W01"].T + p["b01"]
    h3 = jax.nn.relu(h2 @ p["W02"].T + p["b02"])
    flat = h3.reshape(B, P * 13)
    z1 = jax.nn.relu(flat @ p["W1"].T + p["b1"])
    z2 = z1 @ p["W2"].T + p["b2"]
    return jax.nn.sigmoid(z2).reshape(B)


if __name__ == "__main__":
    key = jax.random.PRNGKey(0)
    kx, kp = jax.random.split(key)

    B, P = 2, 4                       # input_size = 4  ->  x: (B, 13, 2*P)
    x = jax.random.normal(kx, (B, 13, 2 * P), dtype=jnp.float32)
    params = init_params(kp, P)

    out = time_combination_nn2_forward(x, params)
    out = jax.block_until_ready(out)

    ref = reference_forward(x, params)
    assert out.shape == (B,)
    assert jnp.allclose(out, ref, atol=2e-5, rtol=1e-4), (out, ref)

    print("KERNEL_OK")
</pallas_src>

<mosaic_0001>
module attributes {stable_mosaic.version = 11 : i64} {
  func.func @_tc_kernel(%arg0: i32, %arg1: memref<8x104xf32, #tpu.memory_space<vmem>>, %arg2: memref<104x52xf32, #tpu.memory_space<vmem>>, %arg3: memref<1x52xf32, #tpu.memory_space<vmem>>, %arg4: memref<52x100xf32, #tpu.memory_space<vmem>>, %arg5: memref<1x100xf32, #tpu.memory_space<vmem>>, %arg6: memref<1x100xf32, #tpu.memory_space<vmem>>, %arg7: memref<1x1xf32, #tpu.memory_space<vmem>>, %arg8: memref<8x1xf32, #tpu.memory_space<vmem>>) attributes {dimension_semantics = [#tpu.dimension_semantics<parallel>], iteration_bounds = array<i64: 1>, scalar_prefetch = 0 : i64, scratch_operands = 0 : i64, tpu.core_type = #tpu.core_type<tc>, window_params = [{transform_indices = @transform_0, window_bounds = array<i64: 8, 104>}, {pipeline_mode = #tpu.pipeline_mode<synchronous>, transform_indices = @transform_1, window_bounds = array<i64: 104, 52>}, {pipeline_mode = #tpu.pipeline_mode<synchronous>, transform_indices = @transform_2, window_bounds = array<i64: 1, 52>}, {pipeline_mode = #tpu.pipeline_mode<synchronous>, transform_indices = @transform_3, window_bounds = array<i64: 52, 100>}, {pipeline_mode = #tpu.pipeline_mode<synchronous>, transform_indices = @transform_4, window_bounds = array<i64: 1, 100>}, {pipeline_mode = #tpu.pipeline_mode<synchronous>, transform_indices = @transform_5, window_bounds = array<i64: 1, 100>}, {pipeline_mode = #tpu.pipeline_mode<synchronous>, transform_indices = @transform_6, window_bounds = array<i64: 1, 1>}, {transform_indices = @transform_7, window_bounds = array<i64: 8, 1>}]} {
    %c0 = arith.constant 0 : index
    %c0_0 = arith.constant 0 : index
    %0 = vector.load %arg1[%c0, %c0_0] : memref<8x104xf32, #tpu.memory_space<vmem>>, vector<8x104xf32>
    %c0_1 = arith.constant 0 : index
    %c0_2 = arith.constant 0 : index
    %1 = vector.load %arg2[%c0_1, %c0_2] : memref<104x52xf32, #tpu.memory_space<vmem>>, vector<104x52xf32>
    %cst = arith.constant dense<0.000000e+00> : vector<8x52xf32>
    %2 = tpu.matmul %0, %1, %cst {dimension_numbers = #tpu.dot_dimension_numbers<[1], [0], [0], [1], [0, 0, 1, 1], [], []>} : vector<8x104xf32>, vector<104x52xf32>, vector<8x52xf32> -> vector<8x52xf32>
    %c0_3 = arith.constant 0 : index
    %c0_4 = arith.constant 0 : index
    %3 = vector.load %arg3[%c0_3, %c0_4] : memref<1x52xf32, #tpu.memory_space<vmem>>, vector<1x52xf32>
    %4 = vector.broadcast %3 : vector<1x52xf32> to vector<8x52xf32>
    %5 = arith.addf %2, %4 : vector<8x52xf32>
    %cst_5 = arith.constant 0.000000e+00 : f32
    %6 = vector.broadcast %cst_5 : f32 to vector<8x52xf32>
    %7 = arith.maximumf %5, %6 : vector<8x52xf32>
    %c0_6 = arith.constant 0 : index
    %c0_7 = arith.constant 0 : index
    %8 = vector.load %arg4[%c0_6, %c0_7] : memref<52x100xf32, #tpu.memory_space<vmem>>, vector<52x100xf32>
    %cst_8 = arith.constant dense<0.000000e+00> : vector<8x100xf32>
    %9 = tpu.matmul %7, %8, %cst_8 {dimension_numbers = #tpu.dot_dimension_numbers<[1], [0], [0], [1], [0, 0, 1, 1], [], []>} : vector<8x52xf32>, vector<52x100xf32>, vector<8x100xf32> -> vector<8x100xf32>
    %c0_9 = arith.constant 0 : index
    %c0_10 = arith.constant 0 : index
    %10 = vector.load %arg5[%c0_9, %c0_10] : memref<1x100xf32, #tpu.memory_space<vmem>>, vector<1x100xf32>
    %11 = vector.broadcast %10 : vector<1x100xf32> to vector<8x100xf32>
    %12 = arith.addf %9, %11 : vector<8x100xf32>
    %cst_11 = arith.constant 0.000000e+00 : f32
    %13 = vector.broadcast %cst_11 : f32 to vector<8x100xf32>
    %14 = arith.maximumf %12, %13 : vector<8x100xf32>
    %c0_12 = arith.constant 0 : index
    %c0_13 = arith.constant 0 : index
    %15 = vector.load %arg6[%c0_12, %c0_13] : memref<1x100xf32, #tpu.memory_space<vmem>>, vector<1x100xf32>
    %16 = vector.broadcast %15 : vector<1x100xf32> to vector<8x100xf32>
    %17 = arith.mulf %14, %16 : vector<8x100xf32>
    %cst_14 = arith.constant dense<0.000000e+00> : vector<8xf32>
    %18 = vector.multi_reduction <add>, %17, %cst_14 [1] : vector<8x100xf32> to vector<8xf32>
    %19 = vector.shape_cast %18 : vector<8xf32> to vector<8x1xf32>
    %c0_15 = arith.constant 0 : index
    %c0_16 = arith.constant 0 : index
    %20 = vector.load %arg7[%c0_15, %c0_16] : memref<1x1xf32, #tpu.memory_space<vmem>>, vector<1x1xf32>
    %21 = vector.broadcast %20 : vector<1x1xf32> to vector<8x1xf32>
    %22 = arith.addf %19, %21 : vector<8x1xf32>
    %23 = arith.negf %22 : vector<8x1xf32>
    %24 = math.exp %23 : vector<8x1xf32>
    %cst_17 = arith.constant 1.000000e+00 : f32
    %25 = vector.broadcast %cst_17 : f32 to vector<8x1xf32>
    %26 = arith.addf %25, %24 : vector<8x1xf32>
    %27 = arith.divf %25, %26 : vector<8x1xf32>
    %c0_18 = arith.constant 0 : index
    %c0_19 = arith.constant 0 : index
    %28 = vector.load %arg8[%c0_18, %c0_19] : memref<8x1xf32, #tpu.memory_space<vmem>>, vector<8x1xf32>
    tpu.vector_store %arg8[%c0_18, %c0_19], %27 {strides = array<i32>} : memref<8x1xf32, #tpu.memory_space<vmem>>, vector<8x1xf32>,
    return
  }
  func.func @transform_0(%arg0: i32) -> (i32, i32) {
    %c0_i32 = arith.constant 0 : i32
    %c0_i32_0 = arith.constant 0 : i32
    return %arg0, %c0_i32 : i32, i32
  }
  func.func @transform_1(%arg0: i32) -> (i32, i32) {
    %c0_i32 = arith.constant 0 : i32
    %c0_i32_0 = arith.constant 0 : i32
    %c0_i32_1 = arith.constant 0 : i32
    return %c0_i32, %c0_i32_0 : i32, i32
  }
  func.func @transform_2(%arg0: i32) -> (i32, i32) {
    %c0_i32 = arith.constant 0 : i32
    %c0_i32_0 = arith.constant 0 : i32
    %c0_i32_1 = arith.constant 0 : i32
    return %c0_i32, %c0_i32_0 : i32, i32
  }
  func.func @transform_3(%arg0: i32) -> (i32, i32) {
    %c0_i32 = arith.constant 0 : i32
    %c0_i32_0 = arith.constant 0 : i32
    %c0_i32_1 = arith.constant 0 : i32
    return %c0_i32, %c0_i32_0 : i32, i32
  }
  func.func @transform_4(%arg0: i32) -> (i32, i32) {
    %c0_i32 = arith.constant 0 : i32
    %c0_i32_0 = arith.constant 0 : i32
    %c0_i32_1 = arith.constant 0 : i32
    return %c0_i32, %c0_i32_0 : i32, i32
  }
  func.func @transform_5(%arg0: i32) -> (i32, i32) {
    %c0_i32 = arith.constant 0 : i32
    %c0_i32_0 = arith.constant 0 : i32
    %c0_i32_1 = arith.constant 0 : i32
    return %c0_i32, %c0_i32_0 : i32, i32
  }
  func.func @transform_6(%arg0: i32) -> (i32, i32) {
    %c0_i32 = arith.constant 0 : i32
    %c0_i32_0 = arith.constant 0 : i32
    %c0_i32_1 = arith.constant 0 : i32
    return %c0_i32, %c0_i32_0 : i32, i32
  }
  func.func @transform_7(%arg0: i32) -> (i32, i32) {
    %c0_i32 = arith.constant 0 : i32
    %c0_i32_0 = arith.constant 0 : i32
    return %arg0, %c0_i32 : i32, i32
  }
}

</mosaic_0001>

<bundles_post_ra>
// kernel: tpu_custom_call.1
= control target key start
LH: loop header
LB: loop body
LE: loop exit
PB: predicated region body
PF: predicated region fallthrough
CT: control target
= control target key end

     0   :  { %vm86_vm0 = vcmask 1043456   ;;  %vm46_vm1 = vcmask 850944   ;;  %vm82_vm2 = vcmask 424960   ;;  %vm116_vm3 = vcmask 818176   ;;  %s280_s1 = inlined_call_operand.vmem [shape: f32[104,52], index: 1, kind: input, shape index: {}]   ;;  %s281_s3 = inlined_call_operand.vmem [shape: f32[52,100], index: 3, kind: input, shape index: {}]   ;;  %s282_s2 = inlined_call_operand.vmem [shape: f32[1,52], index: 2, kind: input, shape index: {}]   ;;  %s283_s0 = inlined_call_operand.vmem [shape: f32[8,104], index: 0, kind: input, shape index: {}]   ;;  %s284_s4 = inlined_call_operand.vmem [shape: f32[1,100], index: 4, kind: input, shape index: {}]   ;;  %s285_s5 = inlined_call_operand.vmem [shape: f32[1,100], index: 5, kind: input, shape index: {}]   ;;  %s286_s6 = inlined_call_operand.<no memory space> [shape: f32[1,1], index: 6, kind: input, shape index: {}]   ;;  %s287_s7 = inlined_call_operand.vmem [shape: f32[8,1], index: 7, kind: output, shape index: {}]  }
   0x1   :  { %v41_v0 = vld [vmem:[%s280_s1 + $0x60] sm:$0xff]  ;;  %v40_v1 = vld [vmem:[%s280_s1 + $0x58] sm:$0xff]  ;;  %v39_v2 = vld [vmem:[%s280_s1 + $0x50] sm:$0xff]  ;;  %v12_v25 = vstv %s286_s6  ;;  %vm144_vm7 = vcmask 7168  }
   0x2   :  { %53 = vmatpush.msra.mxu0 %v41_v0  ;;  %v38_v3 = vld [vmem:[%s280_s1 + $0x48] sm:$0xff]  ;;  %v77_v4 = vld [vmem:[%s281_s3 + $0x30] sm:$0xf]  ;;  %v37_v6 = vld [vmem:[%s280_s1 + $0x40] sm:$0xff]  ;;  %13 = vst [vmem:[#allocation2] sm:$0x1] %v12_v25 }
   0x3   :  { %151 = vmatpush.msk.msra.mxu1 %vm86_vm0, %v77_v4  ;;  %v76_v5 = vld [vmem:[%s281_s3 + $0x28] sm:$0xff]  ;;  %v75_v7 = vld [vmem:[%s281_s3 + $0x20] sm:$0xff]  ;;  %v36_v8 = vld [vmem:[%s280_s1 + $0x38] sm:$0xff] }
   0x4   :  { %54 = vmatpush.msra.mxu0 %v40_v1  ;;  %v74_v9 = vld [vmem:[%s281_s3 + $0x18] sm:$0xff]  ;;  %v35_v10 = vld [vmem:[%s280_s1 + $0x30] sm:$0xff]  ;;  %v34_v11 = vld [vmem:[%s280_s1 + $0x28] sm:$0xff] }
   0x5   :  { %100 = vmatpush.msra.mxu1 %v76_v5  ;;  %v33_v12 = vld [vmem:[%s280_s1 + $0x20] sm:$0xff]  ;;  %v32_v13 = vld [vmem:[%s280_s1 + $0x18] sm:$0xff]  ;;  %v31_v14 = vld [vmem:[%s280_s1 + $0x10] sm:$0xff] }
   0x6   :  { %55 = vmatpush.msra.mxu0 %v39_v2  ;;  %v30_v15 = vld [vmem:[%s280_s1 + $0x8] sm:$0xff]  ;;  %v29_v16 = vld [vmem:[%s280_s1] sm:$0xff]  ;;  %v73_v18 = vld [vmem:[%s281_s3 + $0x10] sm:$0xff] }
   0x7   :  { %101 = vmatpush.msra.mxu1 %v75_v7  ;;  %v28_v17 = vld [vmem:[%s283_s0] sm:$0xff]  ;;  %v72_v19 = vld [vmem:[%s281_s3 + $0x8] sm:$0xff] }
   0x8   :  { %56 = vmatpush.msra.mxu0 %v38_v3  ;;  %v71_v20 = vld [vmem:[%s281_s3] sm:$0xff] }
   0x9   :  { %102 = vmatpush.msra.mxu1 %v74_v9  ;;  %v154_v21 = vld [vmem:[%s282_s2] ss:$0 sm:$0xff] }
   0xa   :  { %57 = vmatpush.msra.mxu0 %v37_v6  ;;  %v155_v26 = vld [vmem:[%s284_s4] ss:$0 sm:$0xff] }
   0xb   :  { %103 = vmatpush.msra.mxu1 %v73_v18  ;;  %v156_v29 = vld [vmem:[%s285_s5] ss:$0 sm:$0xff] }
   0xc   :  { %58 = vmatpush.msra.mxu0 %v36_v8  ;;  %v157_v33 = vld [vmem:[#allocation2] ss:$0 sm:$0xff] }
   0xd   :  { %104 = vmatpush.msra.mxu1 %v72_v19 }
   0xe   :  { %59 = vmatpush.msra.mxu0 %v35_v10 }
   0xf   :  { %105 = vmatpush.msra.mxu1 %v71_v20 }
  0x10   :  { %60 = vmatpush.msra.mxu0 %v34_v11 }
  0x12   :  { %61 = vmatpush.msra.mxu0 %v33_v12 }
  0x14   :  { %62 = vmatpush.msra.mxu0 %v32_v13 }
  0x16   :  { %63 = vmatpush.msra.mxu0 %v31_v14 }
  0x18   :  { %64 = vmatpush.msra.mxu0 %v30_v15 }
  0x1a   :  { %65 = vmatpush.msra.mxu0 %v29_v16 }
  0x1b   :  { %150 = vmatmul.msk.f32.vlgmr.msra.gmra.mxu0 %vm46_vm1, %v28_v17 }
  0x98   :  { %v67_v22 = vpop.f32.mrf.mxu0 }
  0x99   :  { %v68_v23 = vadd.f32 %v154_v21, %v67_v22 }
  0x9b   :  { %v70_v24 = vmax.f32 %v68_v23, 0.0 }
  0x9d   :  { %152 = vmatmul.msk.f32.vlgmr.msra.gmra.mxu1 %vm82_vm2, %v70_v24 }
 0x11a   :  { %v107_v27 = vpop.f32.mrf.mxu1 }
 0x11b   :  { %v108_v28 = vadd.f32 %v155_v26, %v107_v27 }
 0x11d   :  { %v110_v30 = vmax.f32 %v108_v28, 0.0 }
 0x11f   :  { %v115_v31 = vmul.f32 %v156_v29, %v110_v30 }
 0x121   :  { %v117_v32 = vsel %vm116_vm3, %v115_v31, 0.0 }
 0x122   :  { %118 = vadd.xlane.f32.xlu0 %v117_v32 }
 0x195   :  { %v119_v34 = vpop.xlane.xlu0 %118 }
 0x196   :  { %v124_v35 = vadd.f32 %v157_v33, %v119_v34 }
 0x198   :  { %v153_v36 = vmul.f32 -1.442695, %v124_v35 }
 0x19a   :  { %158 = vpow2.f32 %v153_v36 }
 0x1a0   :  { %v159_v37 = vpop.eup %158 }
 0x1a1   :  { %v128_v38 = vadd.f32 1.0, %v159_v37 }
 0x1a3   :  { %160 = vrcp.f32 %v128_v38  ;;  %v140_v42 = vand.u32 2147483648, %v128_v38  ;;  %v138_v44 = vand.u32 2147483647, %v128_v38  ;;  %vm134_vm5 = vweird.f32 %v128_v38 }
 0x1a5   :  { %v141_v46 = vor.u32 1.1754944e-38, %v140_v42  ;;  %vm139_vm8 = vcmp.eq.f32.partialorder %v138_v44, 8.507059e+37 }
 0x1a9   :  { %v161_v39 = vpop.eup %160 }
 0x1aa   :  { %v130_v40 = vmul.f32 %v161_v39, %v128_v38  ;;  %vm135_vm4 = vweird.f32 %v161_v39 }
 0x1ab   :  { %vm136_vm6 = vmor %vm134_vm5, %vm135_vm4 }
 0x1ac   :  { %v131_v41 = vsub.f32 1.0, %v130_v40 }
 0x1ae   :  { %v132_v43 = vmul.f32 %v161_v39, %v131_v41 }
 0x1b0   :  { %v133_v45 = vadd.f32 %v161_v39, %v132_v43 }
 0x1b2   :  { %v137_v47 = vsel %vm136_vm6, %v161_v39, %v133_v45 }
 0x1b3   :  { %v142_v48 = vsel %vm139_vm8, %v141_v46, %v137_v47 }
 0x1b4   :  { %145 = vst.msk [vmem:[%s287_s7] sm:$0xff] %vm144_vm7, %v142_v48 }

</bundles_post_ra>
